<compile_context>
chip_gen: v5e
topology: v5e:2x2
jax: 0.10.0
libtpu: 0.0.40
codegen_flags: <defaults>
</compile_context>

<pallas_src>
import functools

import jax
import jax.numpy as jnp
from jax import lax
from jax.experimental import pallas as pl
from jax.experimental.pallas import tpu as pltpu

KH = KW = 4
STRIDE = 2
PAD = 1
BN_EPS = 1e-5
LRELU_SLOPE = 0.2

_VMEM_LIMIT = 48 * 1024 * 1024  # fits v7x (64 MiB physical) with headroom


def _round_up(x, m):
    return (x + m - 1) // m * m


# ----------------------------------------------------------------------------
# Pass 1: tiled matmul (im2col patches @ weight) + per-M-tile BN partial stats.
# ----------------------------------------------------------------------------
def _conv_stats_kernel(p_ref, w_ref, y_ref, stats_ref, acc_ref):
    kk = pl.program_id(1)

    @pl.when(kk == 0)
    def _():
        acc_ref[...] = jnp.zeros_like(acc_ref)

    acc_ref[...] += jnp.dot(
        p_ref[...], w_ref[...], preferred_element_type=jnp.float32
    )

    @pl.when(kk == pl.num_programs(1) - 1)
    def _():
        y = acc_ref[...]                                   # (m_tile, c_pad) f32
        y_ref[...] = y
        s = jnp.sum(y, axis=0, keepdims=True)              # (1, c_pad)
        ssq = jnp.sum(y * y, axis=0, keepdims=True)        # (1, c_pad)
        fill = jnp.zeros((6, y.shape[1]), jnp.float32)
        stats_ref[...] = jnp.concatenate([s, ssq, fill], axis=0)[None]


# ----------------------------------------------------------------------------
# Pass 2: normalize (folded scale/shift) + LeakyReLU, lane-dense, parallel.
# ----------------------------------------------------------------------------
def _bn_lrelu_kernel(y_ref, scale_ref, shift_ref, o_ref):
    z = y_ref[...] * scale_ref[...] + shift_ref[...]
    o_ref[...] = jnp.maximum(z, LRELU_SLOPE * z).astype(o_ref.dtype)


def _im2col_reflect(x):
    """x: (N, C, H, W) -> patches (N*Ho*Wo, C*KH*KW), reflect pad=1, stride=2."""
    n, c, h, w = x.shape
    ho, wo = h // 2, w // 2
    xp = jnp.pad(x, ((0, 0), (0, 0), (PAD, PAD), (PAD, PAD)), mode="reflect")
    # axis-2 index = kh*KW + kw  (matches weight.reshape(C_out, C_in*KH*KW))
    pats = jnp.stack(
        [
            xp[:, :, kh : kh + STRIDE * ho : STRIDE, kw : kw + STRIDE * wo : STRIDE]
            for kh in range(KH)
            for kw in range(KW)
        ],
        axis=2,
    )  # (N, C, KH*KW, Ho, Wo)
    pats = pats.reshape(n, c * KH * KW, ho, wo)
    pats = pats.transpose(0, 2, 3, 1).reshape(n * ho * wo, c * KH * KW)
    return pats, ho, wo


@functools.partial(jax.jit, static_argnames=("use_dropout",))
def conv_block_forward(x, weight, gamma, beta, use_dropout=False):
    """x: (N, C_in, H, W) NCHW; weight: (C_out, C_in, 4, 4); gamma/beta: (C_out,)."""
    n, c_in, h, w = x.shape
    assert h % 2 == 0 and w % 2 == 0, "ConvBlock (k=4,s=2,p=1) expects even H, W"
    c_out = weight.shape[0]

    patches, ho, wo = _im2col_reflect(x.astype(jnp.float32))
    m, k = patches.shape

    # --- tile / padding geometry --------------------------------------------
    m_tile = min(512, _round_up(m, 128))
    m_pad = _round_up(m, m_tile)
    k_tile = min(_round_up(k, 128), 2048)
    k_pad = _round_up(k, k_tile)
    c_pad = _round_up(c_out, 128)
    m_tiles = m_pad // m_tile
    k_tiles = k_pad // k_tile

    # --- pad & cast operands (bf16 MXU operands, f32 everywhere else) --------
    patches_p = jnp.pad(patches, ((0, m_pad - m), (0, k_pad - k))).astype(jnp.bfloat16)
    w_mat = weight.reshape(c_out, c_in * KH * KW).T.astype(jnp.float32)  # (K, C_out)
    w_p = jnp.pad(w_mat, ((0, k_pad - k), (0, c_pad - c_out))).astype(jnp.bfloat16)
    gamma_p = jnp.pad(gamma.astype(jnp.float32), (0, c_pad - c_out), constant_values=1.0)
    beta_p = jnp.pad(beta.astype(jnp.float32), (0, c_pad - c_out))

    # --- pass 1: conv-as-matmul + per-tile BN partial stats -------------------
    y_pad, stats = pl.pallas_call(
        _conv_stats_kernel,
        out_shape=(
            jax.ShapeDtypeStruct((m_pad, c_pad), jnp.float32),
            jax.ShapeDtypeStruct((m_tiles, 8, c_pad), jnp.float32),
        ),
        grid_spec=pltpu.PrefetchScalarGridSpec(
            num_scalar_prefetch=0,
            grid=(m_tiles, k_tiles),
            in_specs=[
                pl.BlockSpec((m_tile, k_tile), lambda i, kk: (i, kk)),
                pl.BlockSpec((k_tile, c_pad), lambda i, kk: (kk, 0)),
            ],
            out_specs=[
                pl.BlockSpec((m_tile, c_pad), lambda i, kk: (i, 0)),
                pl.BlockSpec((1, 8, c_pad), lambda i, kk: (i, 0, 0)),
            ],
            scratch_shapes=[pltpu.VMEM((m_tile, c_pad), jnp.float32)],
        ),
        compiler_params=pltpu.CompilerParams(
            dimension_semantics=("parallel", "arbitrary"),
            vmem_limit_bytes=_VMEM_LIMIT,
        ),
        cost_estimate=pl.CostEstimate(
            flops=2 * m_pad * k_pad * c_pad,
            transcendentals=0,
            bytes_accessed=(
                m_pad * k_pad * 2
                + m_tiles * k_pad * c_pad * 2
                + m_pad * c_pad * 4
            ),
        ),
    )(patches_p, w_p)

    # --- fold BN statistics into per-channel scale/shift (tiny, plain JAX) ---
    col_sum = jnp.sum(stats[:, 0, :], axis=0)                  # (c_pad,)
    col_ssq = jnp.sum(stats[:, 1, :], axis=0)                  # (c_pad,)
    mean = col_sum / m                                         # true M, not padded
    var = jnp.maximum(col_ssq / m - mean * mean, 0.0)
    scale = gamma_p * lax.rsqrt(var + BN_EPS)
    shift = beta_p - mean * scale

    # --- pass 2: normalize + affine + LeakyReLU (lane-dense, parallel) -------
    out_pad = pl.pallas_call(
        _bn_lrelu_kernel,
        out_shape=jax.ShapeDtypeStruct((m_pad, c_pad), jnp.float32),
        grid_spec=pltpu.PrefetchScalarGridSpec(
            num_scalar_prefetch=0,
            grid=(m_tiles,),
            in_specs=[
                pl.BlockSpec((m_tile, c_pad), lambda i: (i, 0)),
                pl.BlockSpec((1, c_pad), lambda i: (0, 0)),
                pl.BlockSpec((1, c_pad), lambda i: (0, 0)),
            ],
            out_specs=pl.BlockSpec((m_tile, c_pad), lambda i: (i, 0)),
        ),
        compiler_params=pltpu.CompilerParams(
            dimension_semantics=("parallel",),
            vmem_limit_bytes=_VMEM_LIMIT,
        ),
        cost_estimate=pl.CostEstimate(
            flops=3 * m_pad * c_pad,
            transcendentals=0,
            bytes_accessed=2 * m_pad * c_pad * 4,
        ),
    )(y_pad, scale.reshape(1, c_pad), shift.reshape(1, c_pad))

    # TODO(synk): dropout path (use_dropout=True, nn.Dropout(0.5) training-mode)
    # not implemented; default ConvBlock(use_dropout=False) skips it.
    out = out_pad[:m, :c_out].reshape(n, ho, wo, c_out).transpose(0, 3, 1, 2)
    return out


def _reference_forward(x, weight, gamma, beta):
    """Pure-JAX f32 reference matching the PyTorch training-mode forward."""
    xp = jnp.pad(x, ((0, 0), (0, 0), (PAD, PAD), (PAD, PAD)), mode="reflect")
    y = lax.conv_general_dilated(
        xp.astype(jnp.float32),
        weight.astype(jnp.float32),
        window_strides=(STRIDE, STRIDE),
        padding="VALID",
        dimension_numbers=("NCHW", "OIHW", "NCHW"),
    )
    mean = jnp.mean(y, axis=(0, 2, 3), keepdims=True)
    var = jnp.mean((y - mean) ** 2, axis=(0, 2, 3), keepdims=True)
    y = (y - mean) / jnp.sqrt(var + BN_EPS)
    y = y * gamma.reshape(1, -1, 1, 1) + beta.reshape(1, -1, 1, 1)
    return jnp.where(y > 0, y, LRELU_SLOPE * y)


if __name__ == "__main__":
    # Small shapes consistent with ConvBlock(input_channels=4, out_channels=8).
    N, C_IN, C_OUT, H, W = 2, 4, 8, 16, 16

    key = jax.random.PRNGKey(0)
    kx, kw = jax.random.split(key)
    x = jax.random.normal(kx, (N, C_IN, H, W), dtype=jnp.float32)
    # Conv2d weight (bias=False); BatchNorm2d affine init: gamma=1, beta=0.
    weight = jax.random.normal(kw, (C_OUT, C_IN, KH, KW), dtype=jnp.float32) * 0.05
    gamma = jnp.ones((C_OUT,), dtype=jnp.float32)
    beta = jnp.zeros((C_OUT,), dtype=jnp.float32)

    out = conv_block_forward(x, weight, gamma, beta)
    out = jax.block_until_ready(out)

    ref = _reference_forward(x, weight, gamma, beta)
    assert out.shape == (N, C_OUT, H // 2, W // 2), out.shape
    # bf16 MXU operands vs f32 reference -> relaxed tolerance.
    max_err = float(jnp.max(jnp.abs(out - ref)))
    assert jnp.allclose(out, ref, atol=5e-2, rtol=5e-2), max_err

    print("KERNEL_OK")
</pallas_src>

<mosaic_0001>
module attributes {stable_mosaic.version = 11 : i64} {
  func.func @_conv_stats_kernel(%arg0: i32, %arg1: i32, %arg2: memref<128x128xbf16, #tpu.memory_space<vmem>>, %arg3: memref<128x128xbf16, #tpu.memory_space<vmem>>, %arg4: memref<128x128xf32, #tpu.memory_space<vmem>>, %arg5: memref<1x8x128xf32, #tpu.memory_space<vmem>>, %arg6: memref<128x128xf32, #tpu.memory_space<vmem>>) attributes {dimension_semantics = [#tpu.dimension_semantics<parallel>, #tpu.dimension_semantics<arbitrary>], iteration_bounds = array<i64: 1, 1>, scalar_prefetch = 0 : i64, scratch_operands = 1 : i64, tpu.core_type = #tpu.core_type<tc>, window_params = [{transform_indices = @transform_0, window_bounds = array<i64: 128, 128>}, {transform_indices = @transform_1, window_bounds = array<i64: 128, 128>}, {transform_indices = @transform_2, window_bounds = array<i64: 128, 128>}, {transform_indices = @transform_3, window_bounds = array<i64: 1, 8, 128>}]} {
    %c0_i32 = arith.constant 0 : i32
    %0 = arith.cmpi eq, %arg1, %c0_i32 : i32
    %1 = arith.extui %0 : i1 to i32
    %c0_i32_0 = arith.constant 0 : i32
    %2 = arith.cmpi ne, %1, %c0_i32_0 : i32
    scf.if %2 {
      %cst_10 = arith.constant 0.000000e+00 : f32
      %12 = vector.broadcast %cst_10 : f32 to vector<128x128xf32>
      %c0_11 = arith.constant 0 : index
      %c0_12 = arith.constant 0 : index
      %13 = vector.load %arg6[%c0_11, %c0_12] : memref<128x128xf32, #tpu.memory_space<vmem>>, vector<128x128xf32>
      tpu.vector_store %arg6[%c0_11, %c0_12], %12 {strides = array<i32>} : memref<128x128xf32, #tpu.memory_space<vmem>>, vector<128x128xf32>,
    } else {
    }
    %c0 = arith.constant 0 : index
    %c0_1 = arith.constant 0 : index
    %3 = vector.load %arg6[%c0, %c0_1] : memref<128x128xf32, #tpu.memory_space<vmem>>, vector<128x128xf32>
    %c0_2 = arith.constant 0 : index
    %c0_3 = arith.constant 0 : index
    %4 = vector.load %arg2[%c0_2, %c0_3] : memref<128x128xbf16, #tpu.memory_space<vmem>>, vector<128x128xbf16>
    %c0_4 = arith.constant 0 : index
    %c0_5 = arith.constant 0 : index
    %5 = vector.load %arg3[%c0_4, %c0_5] : memref<128x128xbf16, #tpu.memory_space<vmem>>, vector<128x128xbf16>
    %cst = arith.constant dense<0.000000e+00> : vector<128x128xf32>
    %6 = tpu.matmul %4, %5, %cst {dimension_numbers = #tpu.dot_dimension_numbers<[1], [0], [0], [1], [0, 0, 1, 1], [], []>} : vector<128x128xbf16>, vector<128x128xbf16>, vector<128x128xf32> -> vector<128x128xf32>
    %7 = arith.addf %3, %6 : vector<128x128xf32>
    %c0_6 = arith.constant 0 : index
    %c0_7 = arith.constant 0 : index
    %8 = vector.load %arg6[%c0_6, %c0_7] : memref<128x128xf32, #tpu.memory_space<vmem>>, vector<128x128xf32>
    tpu.vector_store %arg6[%c0_6, %c0_7], %7 {strides = array<i32>} : memref<128x128xf32, #tpu.memory_space<vmem>>, vector<128x128xf32>,
    %c0_i32_8 = arith.constant 0 : i32
    %9 = arith.cmpi eq, %arg1, %c0_i32_8 : i32
    %10 = arith.extui %9 : i1 to i32
    %c0_i32_9 = arith.constant 0 : i32
    %11 = arith.cmpi ne, %10, %c0_i32_9 : i32
    scf.if %11 {
      %c0_10 = arith.constant 0 : index
      %c0_11 = arith.constant 0 : index
      %12 = vector.load %arg6[%c0_10, %c0_11] : memref<128x128xf32, #tpu.memory_space<vmem>>, vector<128x128xf32>
      %c0_12 = arith.constant 0 : index
      %c0_13 = arith.constant 0 : index
      %13 = vector.load %arg4[%c0_12, %c0_13] : memref<128x128xf32, #tpu.memory_space<vmem>>, vector<128x128xf32>
      tpu.vector_store %arg4[%c0_12, %c0_13], %12 {strides = array<i32>} : memref<128x128xf32, #tpu.memory_space<vmem>>, vector<128x128xf32>,
      %cst_14 = arith.constant dense<0.000000e+00> : vector<128xf32>
      %14 = vector.multi_reduction <add>, %12, %cst_14 [0] : vector<128x128xf32> to vector<128xf32>
      %15 = vector.shape_cast %14 : vector<128xf32> to vector<1x128xf32>
      %16 = arith.mulf %12, %12 : vector<128x128xf32>
      %cst_15 = arith.constant dense<0.000000e+00> : vector<128xf32>
      %17 = vector.multi_reduction <add>, %16, %cst_15 [0] : vector<128x128xf32> to vector<128xf32>
      %18 = vector.shape_cast %17 : vector<128xf32> to vector<1x128xf32>
      %cst_16 = arith.constant 0.000000e+00 : f32
      %19 = vector.broadcast %cst_16 : f32 to vector<6x128xf32>
      %20 = tpu.concatenate %15, %18, %19 in 0 : vector<1x128xf32>, vector<1x128xf32>, vector<6x128xf32> -> vector<8x128xf32>
      %21 = vector.shape_cast %20 : vector<8x128xf32> to vector<1x8x128xf32>
      %c0_17 = arith.constant 0 : index
      %c0_18 = arith.constant 0 : index
      %c0_19 = arith.constant 0 : index
      %22 = vector.load %arg5[%c0_17, %c0_18, %c0_19] : memref<1x8x128xf32, #tpu.memory_space<vmem>>, vector<1x8x128xf32>
      tpu.vector_store %arg5[%c0_17, %c0_18, %c0_19], %21 {strides = array<i32>} : memref<1x8x128xf32, #tpu.memory_space<vmem>>, vector<1x8x128xf32>,
    } else {
    }
    return
  }
  func.func @transform_0(%arg0: i32, %arg1: i32) -> (i32, i32) {
    %c0_i32 = arith.constant 0 : i32
    return %arg0, %arg1 : i32, i32
  }
  func.func @transform_1(%arg0: i32, %arg1: i32) -> (i32, i32) {
    %c0_i32 = arith.constant 0 : i32
    %c0_i32_0 = arith.constant 0 : i32
    return %arg1, %c0_i32 : i32, i32
  }
  func.func @transform_2(%arg0: i32, %arg1: i32) -> (i32, i32) {
    %c0_i32 = arith.constant 0 : i32
    %c0_i32_0 = arith.constant 0 : i32
    return %arg0, %c0_i32 : i32, i32
  }
  func.func @transform_3(%arg0: i32, %arg1: i32) -> (i32, i32, i32) {
    %c0_i32 = arith.constant 0 : i32
    %c0_i32_0 = arith.constant 0 : i32
    %c0_i32_1 = arith.constant 0 : i32
    return %arg0, %c0_i32, %c0_i32_0 : i32, i32, i32
  }
}

module attributes {stable_mosaic.version = 11 : i64} {
  func.func @_bn_lrelu_kernel(%arg0: i32, %arg1: memref<128x128xf32, #tpu.memory_space<vmem>>, %arg2: memref<1x128xf32, #tpu.memory_space<vmem>>, %arg3: memref<1x128xf32, #tpu.memory_space<vmem>>, %arg4: memref<128x128xf32, #tpu.memory_space<vmem>>) attributes {dimension_semantics = [#tpu.dimension_semantics<parallel>], iteration_bounds = array<i64: 1>, scalar_prefetch = 0 : i64, scratch_operands = 0 : i64, tpu.core_type = #tpu.core_type<tc>, window_params = [{transform_indices = @transform_0, window_bounds = array<i64: 128, 128>}, {pipeline_mode = #tpu.pipeline_mode<synchronous>, transform_indices = @transform_1, window_bounds = array<i64: 1, 128>}, {pipeline_mode = #tpu.pipeline_mode<synchronous>, transform_indices = @transform_2, window_bounds = array<i64: 1, 128>}, {transform_indices = @transform_3, window_bounds = array<i64: 128, 128>}]} {
    %c0 = arith.constant 0 : index
    %c0_0 = arith.constant 0 : index
    %0 = vector.load %arg1[%c0, %c0_0] : memref<128x128xf32, #tpu.memory_space<vmem>>, vector<128x128xf32>
    %c0_1 = arith.constant 0 : index
    %c0_2 = arith.constant 0 : index
    %1 = vector.load %arg2[%c0_1, %c0_2] : memref<1x128xf32, #tpu.memory_space<vmem>>, vector<1x128xf32>
    %2 = vector.broadcast %1 : vector<1x128xf32> to vector<128x128xf32>
    %3 = arith.mulf %0, %2 : vector<128x128xf32>
    %c0_3 = arith.constant 0 : index
    %c0_4 = arith.constant 0 : index
    %4 = vector.load %arg3[%c0_3, %c0_4] : memref<1x128xf32, #tpu.memory_space<vmem>>, vector<1x128xf32>
    %5 = vector.broadcast %4 : vector<1x128xf32> to vector<128x128xf32>
    %6 = arith.addf %3, %5 : vector<128x128xf32>
    %cst = arith.constant 2.000000e-01 : f32
    %7 = vector.broadcast %cst : f32 to vector<128x128xf32>
    %8 = arith.mulf %7, %6 : vector<128x128xf32>
    %9 = arith.maximumf %6, %8 : vector<128x128xf32>
    %c0_5 = arith.constant 0 : index
    %c0_6 = arith.constant 0 : index
    %10 = vector.load %arg4[%c0_5, %c0_6] : memref<128x128xf32, #tpu.memory_space<vmem>>, vector<128x128xf32>
    tpu.vector_store %arg4[%c0_5, %c0_6], %9 {strides = array<i32>} : memref<128x128xf32, #tpu.memory_space<vmem>>, vector<128x128xf32>,
    return
  }
  func.func @transform_0(%arg0: i32) -> (i32, i32) {
    %c0_i32 = arith.constant 0 : i32
    %c0_i32_0 = arith.constant 0 : i32
    return %arg0, %c0_i32 : i32, i32
  }
  func.func @transform_1(%arg0: i32) -> (i32, i32) {
    %c0_i32 = arith.constant 0 : i32
    %c0_i32_0 = arith.constant 0 : i32
    %c0_i32_1 = arith.constant 0 : i32
    return %c0_i32, %c0_i32_0 : i32, i32
  }
  func.func @transform_2(%arg0: i32) -> (i32, i32) {
    %c0_i32 = arith.constant 0 : i32
    %c0_i32_0 = arith.constant 0 : i32
    %c0_i32_1 = arith.constant 0 : i32
    return %c0_i32, %c0_i32_0 : i32, i32
  }
  func.func @transform_3(%arg0: i32) -> (i32, i32) {
    %c0_i32 = arith.constant 0 : i32
    %c0_i32_0 = arith.constant 0 : i32
    return %arg0, %c0_i32 : i32, i32
  }
}

</mosaic_0001>

<bundles_post_ra>
// kernel: conv_block_forward.3
= control target key start
LH: loop header
LB: loop body
LE: loop exit
PB: predicated region body
PF: predicated region fallthrough
CT: control target
= control target key end

     0   :  { %s282_s0 = inlined_call_operand.vmem [shape: f32[128,128], index: 0, kind: input, shape index: {}]   ;;  %s283_s1 = inlined_call_operand.vmem [shape: f32[1,128], index: 1, kind: input, shape index: {}]   ;;  %s284_s2 = inlined_call_operand.vmem [shape: f32[1,128], index: 2, kind: input, shape index: {}]   ;;  %s285_s3 = inlined_call_operand.vmem [shape: f32[128,128], index: 3, kind: output, shape index: {}]  }
   0x1   :  { %v14_v0 = vld [vmem:[%s282_s0] sm:$0xff]  ;;  %v15_v3 = vld [vmem:[%s282_s0 + $0x8] sm:$0xff]  ;;  %v16_v6 = vld [vmem:[%s282_s0 + $0x10] sm:$0xff] }
   0x2   :  { %v150_v1 = vld [vmem:[%s283_s1] ss:$0 sm:$0xff]  ;;  %v17_v7 = vld [vmem:[%s282_s0 + $0x18] sm:$0xff]  ;;  %v19_v12 = vld [vmem:[%s282_s0 + $0x28] sm:$0xff] }
   0x3   :  { %v155_v2 = vld [vmem:[%s284_s2] ss:$0 sm:$0xff]  ;;  %v34_v4 = vmul.f32 %v150_v1, %v14_v0  ;;  %v35_v5 = vmul.f32 %v150_v1, %v15_v3  ;;  %v36_v9 = vmul.f32 %v150_v1, %v16_v6  ;;  %v37_v10 = vmul.f32 %v150_v1, %v17_v7  ;;  %v20_v13 = vld [vmem:[%s282_s0 + $0x30] sm:$0xff]  ;;  %v21_v14 = vld [vmem:[%s282_s0 + $0x38] sm:$0xff] }
   0x4   :  { %v18_v8 = vld [vmem:[%s282_s0 + $0x20] sm:$0xff]  ;;  %v39_v17 = vmul.f32 %v150_v1, %v19_v12  ;;  %v40_v18 = vmul.f32 %v150_v1, %v20_v13  ;;  %v41_v22 = vmul.f32 %v150_v1, %v21_v14  ;;  %v23_v28 = vld [vmem:[%s282_s0 + $0x48] sm:$0xff]  ;;  %v24_v29 = vld [vmem:[%s282_s0 + $0x50] sm:$0xff] }
   0x5   :  { %v38_v11 = vmul.f32 %v150_v1, %v18_v8  ;;  %v54_v15 = vadd.f32 %v155_v2, %v34_v4  ;;  %v55_v16 = vadd.f32 %v155_v2, %v35_v5  ;;  %v56_v19 = vadd.f32 %v155_v2, %v36_v9  ;;  %v22_v23 = vld [vmem:[%s282_s0 + $0x40] sm:$0xff]  ;;  %v25_v38 = vld [vmem:[%s282_s0 + $0x58] sm:$0xff]  ;;  %v27_v44 = vld [vmem:[%s282_s0 + $0x68] sm:$0xff] }
   0x6   :  { %v57_v20 = vadd.f32 %v155_v2, %v37_v10  ;;  %v59_v26 = vadd.f32 %v155_v2, %v39_v17  ;;  %v60_v27 = vadd.f32 %v155_v2, %v40_v18  ;;  %v61_v33 = vadd.f32 %v155_v2, %v41_v22  ;;  %v26_v39 = vld [vmem:[%s282_s0 + $0x60] sm:$0xff]  ;;  %v28_v45 = vld [vmem:[%s282_s0 + $0x70] sm:$0xff]  ;;  %v29_v50 = vld [vmem:[%s282_s0 + $0x78] sm:$0xff] }
   0x7   :  { %v58_v21 = vadd.f32 %v155_v2, %v38_v11  ;;  %v70_v24 = vmul.f32 0.2, %v54_v15  ;;  %v71_v25 = vmul.f32 0.2, %v55_v16  ;;  %v72_v30 = vmul.f32 0.2, %v56_v19 }
   0x8   :  { %v73_v31 = vmul.f32 0.2, %v57_v20  ;;  %v75_v36 = vmul.f32 0.2, %v59_v26  ;;  %v76_v37 = vmul.f32 0.2, %v60_v27  ;;  %v42_v48 = vmul.f32 %v150_v1, %v22_v23 }
   0x9   :  { %v74_v32 = vmul.f32 0.2, %v58_v21  ;;  %v86_v34 = vmax.f32 %v54_v15, %v70_v24  ;;  %v87_v35 = vmax.f32 %v55_v16, %v71_v25  ;;  %v88_v40 = vmax.f32 %v56_v19, %v72_v30 }
   0xa   :  { %v89_v41 = vmax.f32 %v57_v20, %v73_v31  ;;  %v77_v43 = vmul.f32 0.2, %v61_v33  ;;  %v91_v46 = vmax.f32 %v59_v26, %v75_v36  ;;  %v92_v47 = vmax.f32 %v60_v27, %v76_v37 }
   0xb   :  { %v90_v42 = vmax.f32 %v58_v21, %v74_v32  ;;  %102 = vst [vmem:[%s285_s3] sm:$0xff] %v86_v34  ;;  %v43_v49 = vmul.f32 %v150_v1, %v23_v28  ;;  %v44_v52 = vmul.f32 %v150_v1, %v24_v29  ;;  %v45_v53 = vmul.f32 %v150_v1, %v25_v38 }
   0xc   :  { %103 = vst [vmem:[%s285_s3 + $0x8] sm:$0xff] %v87_v35  ;;  %v93_v51 = vmax.f32 %v61_v33, %v77_v43  ;;  %v46_v54 = vmul.f32 %v150_v1, %v26_v39  ;;  %v62_v55 = vadd.f32 %v155_v2, %v42_v48  ;;  %v47_v57 = vmul.f32 %v150_v1, %v27_v44 }
   0xd   :  { %104 = vst [vmem:[%s285_s3 + $0x10] sm:$0xff] %v88_v40  ;;  %v63_v56 = vadd.f32 %v155_v2, %v43_v49  ;;  %v48_v58 = vmul.f32 %v150_v1, %v28_v45  ;;  %v64_v59 = vadd.f32 %v155_v2, %v44_v52  ;;  %v65_v60 = vadd.f32 %v155_v2, %v45_v53 }
   0xe   :  { %105 = vst [vmem:[%s285_s3 + $0x18] sm:$0xff] %v89_v41  ;;  %v66_v61 = vadd.f32 %v155_v2, %v46_v54  ;;  %v49_v62 = vmul.f32 %v150_v1, %v29_v50  ;;  %v78_v63 = vmul.f32 0.2, %v62_v55  ;;  %v67_v3 = vadd.f32 %v155_v2, %v47_v57 }
   0xf   :  { %106 = vst [vmem:[%s285_s3 + $0x20] sm:$0xff] %v90_v42  ;;  %v79_v0 = vmul.f32 0.2, %v63_v56  ;;  %v68_v4 = vadd.f32 %v155_v2, %v48_v58  ;;  %v80_v5 = vmul.f32 0.2, %v64_v59 }
  0x10   :  { %107 = vst [vmem:[%s285_s3 + $0x28] sm:$0xff] %v91_v46  ;;  %v81_v6 = vmul.f32 0.2, %v65_v60  ;;  %v69_v7 = vadd.f32 %v155_v2, %v49_v62  ;;  %v94_v1 = vmax.f32 %v62_v55, %v78_v63  ;;  %v82_v9 = vmul.f32 0.2, %v66_v61 }
  0x11   :  { %108 = vst [vmem:[%s285_s3 + $0x30] sm:$0xff] %v92_v47  ;;  %v95_v8 = vmax.f32 %v63_v56, %v79_v0  ;;  %v83_v10 = vmul.f32 0.2, %v67_v3  ;;  %v96_v11 = vmax.f32 %v64_v59, %v80_v5  ;;  %v84_v13 = vmul.f32 0.2, %v68_v4 }
  0x12   :  { %109 = vst [vmem:[%s285_s3 + $0x38] sm:$0xff] %v93_v51  ;;  %v97_v12 = vmax.f32 %v65_v60, %v81_v6  ;;  %v85_v14 = vmul.f32 0.2, %v69_v7  ;;  %v98_v2 = vmax.f32 %v66_v61, %v82_v9 }
  0x13   :  { %110 = vst [vmem:[%s285_s3 + $0x40] sm:$0xff] %v94_v1  ;;  %v99_v15 = vmax.f32 %v67_v3, %v83_v10  ;;  %v100_v16 = vmax.f32 %v68_v4, %v84_v13 }
  0x14   :  { %111 = vst [vmem:[%s285_s3 + $0x48] sm:$0xff] %v95_v8  ;;  %v101_v17 = vmax.f32 %v69_v7, %v85_v14 }
  0x15   :  { %112 = vst [vmem:[%s285_s3 + $0x50] sm:$0xff] %v96_v11 }
  0x16   :  { %113 = vst [vmem:[%s285_s3 + $0x58] sm:$0xff] %v97_v12 }
  0x17   :  { %114 = vst [vmem:[%s285_s3 + $0x60] sm:$0xff] %v98_v2 }
  0x18   :  { %115 = vst [vmem:[%s285_s3 + $0x68] sm:$0xff] %v99_v15 }
  0x19   :  { %116 = vst [vmem:[%s285_s3 + $0x70] sm:$0xff] %v100_v16 }
  0x1a   :  { %117 = vst [vmem:[%s285_s3 + $0x78] sm:$0xff] %v101_v17 }

// kernel: conv_block_forward.2
= control target key start
LH: loop header
LB: loop body
LE: loop exit
PB: predicated region body
PF: predicated region fallthrough
CT: control target
= control target key end

     0   :  { %vm351_vm0 = vcmask 1040384   ;;  %vm353_vm1 = vcmask 1041408   ;;  %s587_s1 = inlined_call_operand.vmem [shape: bf16[128,128], index: 1, kind: input, shape index: {}]   ;;  %s588_s0 = inlined_call_operand.vmem [shape: bf16[128,128], index: 0, kind: input, shape index: {}]   ;;  %s589_s2 = inlined_call_operand.vmem [shape: f32[128,128], index: 2, kind: output, shape index: {0}]   ;;  %s590_s3 = inlined_call_operand.vmem [shape: f32[1,8,128], index: 3, kind: output, shape index: {1}]  }
   0x1   :  { %v443_v0 = vld [vmem:[%s587_s1 + $0x38] sm:$0xff]  ;;  %v442_v1 = vld [vmem:[%s587_s1 + $0x30] sm:$0xff]  ;;  %v441_v2 = vld [vmem:[%s587_s1 + $0x28] sm:$0xff] }
   0x2   :  { %177 = vmatpush.bf16.msra.mxu0 %v443_v0  ;;  %444 = vmatpush.bf16.msra.mxu1 %v443_v0  ;;  %v440_v3 = vld [vmem:[%s587_s1 + $0x20] sm:$0xff]  ;;  %v439_v4 = vld [vmem:[%s587_s1 + $0x18] sm:$0xff]  ;;  %v438_v5 = vld [vmem:[%s587_s1 + $0x10] sm:$0xff] }
   0x3   :  { %445 = vmatpush.bf16.msra.mxu2 %v443_v0  ;;  %446 = vmatpush.bf16.msra.mxu3 %v443_v0  ;;  %v437_v6 = vld [vmem:[%s587_s1 + $0x8] sm:$0xff]  ;;  %v436_v7 = vld [vmem:[%s587_s1] sm:$0xff]  ;;  %v430_v9 = vld [vmem:[%s588_s0 + $0x10] sm:$0xff] }
   0x4   :  { %v428_v8 = vld [vmem:[%s588_s0] sm:$0xff]  ;;  %v434_v11 = vld [vmem:[%s588_s0 + $0x30] sm:$0xff]  ;;  %v429_v12 = vld [vmem:[%s588_s0 + $0x8] sm:$0xff] }
   0x5   :  { %v432_v10 = vld [vmem:[%s588_s0 + $0x20] sm:$0xff]  ;;  %v431_v13 = vld [vmem:[%s588_s0 + $0x18] sm:$0xff]  ;;  %v433_v14 = vld [vmem:[%s588_s0 + $0x28] sm:$0xff] }
   0x6   :  { %178 = vmatpush.bf16.msra.mxu0 %v442_v1  ;;  %447 = vmatpush.bf16.msra.mxu1 %v442_v1  ;;  %v435_v15 = vld [vmem:[%s588_s0 + $0x38] sm:$0xff] }
   0x7   :  { %448 = vmatpush.bf16.msra.mxu2 %v442_v1  ;;  %449 = vmatpush.bf16.msra.mxu3 %v442_v1 }
   0xa   :  { %179 = vmatpush.bf16.msra.mxu0 %v441_v2  ;;  %450 = vmatpush.bf16.msra.mxu1 %v441_v2 }
   0xb   :  { %451 = vmatpush.bf16.msra.mxu2 %v441_v2  ;;  %452 = vmatpush.bf16.msra.mxu3 %v441_v2 }
   0xe   :  { %180 = vmatpush.bf16.msra.mxu0 %v440_v3  ;;  %453 = vmatpush.bf16.msra.mxu1 %v440_v3 }
   0xf   :  { %454 = vmatpush.bf16.msra.mxu2 %v440_v3  ;;  %455 = vmatpush.bf16.msra.mxu3 %v440_v3 }
  0x12   :  { %181 = vmatpush.bf16.msra.mxu0 %v439_v4  ;;  %456 = vmatpush.bf16.msra.mxu1 %v439_v4 }
  0x13   :  { %457 = vmatpush.bf16.msra.mxu2 %v439_v4  ;;  %458 = vmatpush.bf16.msra.mxu3 %v439_v4 }
  0x16   :  { %182 = vmatpush.bf16.msra.mxu0 %v438_v5  ;;  %459 = vmatpush.bf16.msra.mxu1 %v438_v5 }
  0x17   :  { %460 = vmatpush.bf16.msra.mxu2 %v438_v5  ;;  %461 = vmatpush.bf16.msra.mxu3 %v438_v5 }
  0x1a   :  { %183 = vmatpush.bf16.msra.mxu0 %v437_v6  ;;  %462 = vmatpush.bf16.msra.mxu1 %v437_v6 }
  0x1b   :  { %463 = vmatpush.bf16.msra.mxu2 %v437_v6  ;;  %464 = vmatpush.bf16.msra.mxu3 %v437_v6 }
  0x1e   :  { %184 = vmatpush.bf16.msra.mxu0 %v436_v7  ;;  %465 = vmatpush.bf16.msra.mxu1 %v436_v7 }
  0x1f   :  { %466 = vmatpush.bf16.msra.mxu2 %v436_v7  ;;  %467 = vmatpush.bf16.msra.mxu3 %v436_v7 }
  0x21   :  { %185 = vmatmul.bf16.vlgmr.msra.gmra.mxu0 %v428_v8  ;;  %195 = vmatmul.bf16.vlgmr.msra.gmra.mxu1 %v430_v9 }
  0x22   :  { %205 = vmatmul.bf16.vlgmr.msra.gmra.mxu2 %v432_v10  ;;  %215 = vmatmul.bf16.vlgmr.msra.gmra.mxu3 %v434_v11 }
  0x31   :  { %190 = vmatmul.bf16.gmra.mxu0 %v429_v12  ;;  %200 = vmatmul.bf16.gmra.mxu1 %v431_v13 }
  0x32   :  { %210 = vmatmul.bf16.gmra.mxu2 %v433_v14  ;;  %220 = vmatmul.bf16.gmra.mxu3 %v435_v15 }
  0x9e   :  { %v186_v16 = vpop.f32.mrf.mxu0  ;;  %v196_v17 = vpop.f32.mrf.mxu1 }
  0x9f   :  { %277 = vst [vmem:[%s589_s2] sm:$0xff] %v186_v16  ;;  %v314_v27 = vmul.f32 %v186_v16, %v186_v16  ;;  %v318_v39 = vmul.f32 %v196_v17, %v196_v17 }
  0xa0   :  { %281 = vst [vmem:[%s589_s2 + $0x20] sm:$0xff] %v196_v17 }
  0xa5   :  { %v206_v18 = vpop.f32.mrf.mxu2  ;;  %v216_v19 = vpop.f32.mrf.mxu3 }
  0xa6   :  { %v188_v20 = vpop.f32.mrf.mxu0  ;;  %v198_v21 = vpop.f32.mrf.mxu1  ;;  %285 = vst [vmem:[%s589_s2 + $0x40] sm:$0xff] %v206_v18  ;;  %v322_v53 = vmul.f32 %v206_v18, %v206_v18  ;;  %v326_v1 = vmul.f32 %v216_v19, %v216_v19 }
  0xa7   :  { %278 = vst [vmem:[%s589_s2 + $0x8] sm:$0xff] %v188_v20  ;;  %v315_v26 = vmul.f32 %v188_v20, %v188_v20  ;;  %v293_v28 = vadd.f32 %v188_v20, %v186_v16  ;;  %v319_v42 = vmul.f32 %v198_v21, %v198_v21 }
  0xa8   :  { %282 = vst [vmem:[%s589_s2 + $0x28] sm:$0xff] %v198_v21 }
  0xa9   :  { %289 = vst [vmem:[%s589_s2 + $0x60] sm:$0xff] %v216_v19  ;;  %v330_v30 = vadd.f32 %v315_v26, %v314_v27 }
  0xad   :  { %v208_v22 = vpop.f32.mrf.mxu2  ;;  %v218_v23 = vpop.f32.mrf.mxu3 }
  0xae   :  { %v191_v24 = vpop.f32.mrf.mxu0  ;;  %v201_v25 = vpop.f32.mrf.mxu1  ;;  %286 = vst [vmem:[%s589_s2 + $0x48] sm:$0xff] %v208_v22  ;;  %v323_v56 = vmul.f32 %v208_v22, %v208_v22  ;;  %v327_v4 = vmul.f32 %v218_v23, %v218_v23 }
  0xaf   :  { %279 = vst [vmem:[%s589_s2 + $0x10] sm:$0xff] %v191_v24  ;;  %v316_v29 = vmul.f32 %v191_v24, %v191_v24  ;;  %v294_v31 = vadd.f32 %v293_v28, %v191_v24  ;;  %v320_v45 = vmul.f32 %v201_v25, %v201_v25 }
  0xb0   :  { %283 = vst [vmem:[%s589_s2 + $0x30] sm:$0xff] %v201_v25 }
  0xb1   :  { %290 = vst [vmem:[%s589_s2 + $0x68] sm:$0xff] %v218_v23  ;;  %v331_v36 = vadd.f32 %v330_v30, %v316_v29 }
  0xb5   :  { %v211_v32 = vpop.f32.mrf.mxu2  ;;  %v221_v33 = vpop.f32.mrf.mxu3 }
  0xb6   :  { %v193_v34 = vpop.f32.mrf.mxu0  ;;  %v203_v35 = vpop.f32.mrf.mxu1  ;;  %287 = vst [vmem:[%s589_s2 + $0x50] sm:$0xff] %v211_v32  ;;  %v324_v60 = vmul.f32 %v211_v32, %v211_v32  ;;  %v328_v8 = vmul.f32 %v221_v33, %v221_v33 }
  0xb7   :  { %280 = vst [vmem:[%s589_s2 + $0x18] sm:$0xff] %v193_v34  ;;  %v295_v37 = vadd.f32 %v294_v31, %v193_v34  ;;  %v317_v38 = vmul.f32 %v193_v34, %v193_v34  ;;  %v321_v51 = vmul.f32 %v203_v35, %v203_v35 }
  0xb8   :  { %284 = vst [vmem:[%s589_s2 + $0x38] sm:$0xff] %v203_v35 }
  0xb9   :  { %v296_v40 = vadd.f32 %v295_v37, %v196_v17  ;;  %v332_v41 = vadd.f32 %v331_v36, %v317_v38  ;;  %291 = vst [vmem:[%s589_s2 + $0x70] sm:$0xff] %v221_v33 }
  0xbb   :  { %v333_v43 = vadd.f32 %v332_v41, %v318_v39  ;;  %v297_v44 = vadd.f32 %v296_v40, %v198_v21 }
  0xbd   :  { %v298_v46 = vadd.f32 %v297_v44, %v201_v25  ;;  %v334_v47 = vadd.f32 %v333_v43, %v319_v42  ;;  %v213_v48 = vpop.f32.mrf.mxu2  ;;  %v223_v49 = vpop.f32.mrf.mxu3 }
  0xbe   :  { %288 = vst [vmem:[%s589_s2 + $0x58] sm:$0xff] %v213_v48  ;;  %v325_v0 = vmul.f32 %v213_v48, %v213_v48  ;;  %v329_v12 = vmul.f32 %v223_v49, %v223_v49 }
  0xbf   :  { %v299_v50 = vadd.f32 %v298_v46, %v203_v35  ;;  %v335_v52 = vadd.f32 %v334_v47, %v320_v45  ;;  %292 = vst [vmem:[%s589_s2 + $0x78] sm:$0xff] %v223_v49 }
  0xc1   :  { %v300_v54 = vadd.f32 %v299_v50, %v206_v18  ;;  %v336_v55 = vadd.f32 %v335_v52, %v321_v51 }
  0xc3   :  { %v337_v57 = vadd.f32 %v336_v55, %v322_v53  ;;  %v301_v58 = vadd.f32 %v300_v54, %v208_v22 }
  0xc5   :  { %v302_v59 = vadd.f32 %v301_v58, %v211_v32  ;;  %v338_v61 = vadd.f32 %v337_v57, %v323_v56 }
  0xc7   :  { %v339_v62 = vadd.f32 %v338_v61, %v324_v60  ;;  %v303_v63 = vadd.f32 %v302_v59, %v213_v48 }
  0xc9   :  { %v304_v2 = vadd.f32 %v303_v63, %v216_v19  ;;  %v340_v3 = vadd.f32 %v339_v62, %v325_v0 }
  0xcb   :  { %v341_v5 = vadd.f32 %v340_v3, %v326_v1  ;;  %v305_v6 = vadd.f32 %v304_v2, %v218_v23 }
  0xcd   :  { %v306_v7 = vadd.f32 %v305_v6, %v221_v33  ;;  %v342_v9 = vadd.f32 %v341_v5, %v327_v4 }
  0xcf   :  { %v343_v10 = vadd.f32 %v342_v9, %v328_v8  ;;  %v307_v11 = vadd.f32 %v306_v7, %v223_v49 }
  0xd1   :  { %v308_v13 = vrot.slane %v307_v11, 4  ;;  %v344_v14 = vadd.f32 %v343_v10, %v329_v12 }
  0xd3   :  { %v309_v15 = vadd.f32 %v308_v13, %v307_v11  ;;  %v345_v16 = vrot.slane %v344_v14, 4 }
  0xd5   :  { %v310_v17 = vrot.slane %v309_v15, 2  ;;  %v346_v18 = vadd.f32 %v345_v16, %v344_v14 }
  0xd7   :  { %v311_v20 = vadd.f32 %v310_v17, %v309_v15  ;;  %v347_v21 = vrot.slane %v346_v18, 2 }
  0xd9   :  { %v312_v22 = vrot.slane %v311_v20, 1  ;;  %v348_v19 = vadd.f32 %v347_v21, %v346_v18 }
  0xdb   :  { %v349_v24 = vrot.slane %v348_v19, 1  ;;  %v313_v25 = vadd.f32 %v312_v22, %v311_v20 }
  0xdd   :  { %v350_v23 = vadd.f32 %v349_v24, %v348_v19 }
  0xdf   :  { %v352_v26 = vsel %vm351_vm0, %v313_v25, %v350_v23 }
  0xe0   :  { %v354_v27 = vsel %vm353_vm1, %v352_v26, 0.0 }
  0xe1   :  { %355 = vst [vmem:[%s590_s3] sm:$0xff] %v354_v27 }

</bundles_post_ra>
